<compile_context>
chip_gen: v7x
topology: tpu7x:2x2x1
jax: 0.10.0
libtpu: 0.0.40
codegen_flags: <defaults>
</compile_context>

<pallas_src>
import functools
import math

import jax
import jax.numpy as jnp
from jax import lax
from jax.experimental import pallas as pl
from jax.experimental.pallas import tpu as pltpu


def _round_up(n, m):
    return ((n + m - 1) // m) * m


def _keep_mask(shape, seed_ref, salt):
    """Deterministic per-element keep mask with keep-prob 0.5.

    Counter-based integer hash of (seed, program_id, layer-salt, row, col).
    Works under both Mosaic (TPU) and interpret (CPU) lowering.
    """
    seed_u = lax.convert_element_type(seed_ref[0], jnp.uint32)
    pid_u = lax.convert_element_type(pl.program_id(0), jnp.uint32)
    base = (seed_u * jnp.uint32(0x9E3779B1)
            + pid_u * jnp.uint32(0x85EBCA77)
            + jnp.uint32(salt) * jnp.uint32(0xC2B2AE3D))

    r = lax.broadcasted_iota(jnp.int32, shape, 0).astype(jnp.uint32)
    c = lax.broadcasted_iota(jnp.int32, shape, 1).astype(jnp.uint32)
    x = r * jnp.uint32(0x01000193) + c + base
    # murmur-style finalizer
    x = x ^ lax.shift_right_logical(x, jnp.uint32(16))
    x = x * jnp.uint32(0x7FEB352D)
    x = x ^ lax.shift_right_logical(x, jnp.uint32(15))
    x = x * jnp.uint32(0x846CA68B)
    x = x ^ lax.shift_right_logical(x, jnp.uint32(16))
    return x < jnp.uint32(1 << 31)   # P(keep) = 0.5


def _prenet_kernel(training, seed_ref, x_ref, w1_ref, b1_ref, w2_ref, b2_ref, o_ref):
    # Layer 1: Linear (bf16 MXU, f32 acc) -> bias -> ReLU -> Dropout (scale folded into w2)
    h = jnp.dot(x_ref[...], w1_ref[...], preferred_element_type=jnp.float32)
    h = jnp.maximum(h + b1_ref[...], 0.0)
    if training:
        h = jnp.where(_keep_mask(h.shape, seed_ref, 1), h, 0.0)

    # Layer 2: Linear -> bias -> ReLU -> Dropout (explicit 1/(1-p)=2 scale)
    h = jnp.dot(h.astype(w2_ref.dtype), w2_ref[...],
                preferred_element_type=jnp.float32)
    h = jnp.maximum(h + b2_ref[...], 0.0)
    if training:
        h = jnp.where(_keep_mask(h.shape, seed_ref, 2), h * 2.0, 0.0)

    o_ref[...] = h.astype(o_ref.dtype)


def prenet_forward(x, params, *, seed=0, training=True):
    """x: (..., num_mels) -> (..., hidden)."""
    w1, b1, w2, b2 = params          # w1: (num_mels, H), w2: (H, H), biases: (1, H)
    num_mels, hidden = w1.shape
    leading = x.shape[:-1]
    rows = math.prod(leading) if leading else 1

    # Lane-dense hidden dim and row tiling.
    h_pad = _round_up(hidden, 128)
    tm = min(512, _round_up(rows, 8))           # row tile, multiple of 8
    rows_p = _round_up(rows, tm)
    grid = (rows_p // tm,)

    # Prepare inputs: pad rows, cast activations/weights to bf16, keep biases f32.
    x2 = x.reshape(rows, num_mels)
    if rows_p != rows:
        x2 = jnp.pad(x2, ((0, rows_p - rows), (0, 0)))
    x2 = x2.astype(jnp.bfloat16)

    # Fold the layer-1 dropout scale (1/(1-p) = 2) into w2 when training.
    w2_eff = w2 * 2.0 if training else w2

    ph = h_pad - hidden
    w1p = jnp.pad(w1, ((0, 0), (0, ph))).astype(jnp.bfloat16)
    b1p = jnp.pad(b1, ((0, 0), (0, ph))).astype(jnp.float32)
    w2p = jnp.pad(w2_eff, ((0, ph), (0, ph))).astype(jnp.bfloat16)
    b2p = jnp.pad(b2, ((0, 0), (0, ph))).astype(jnp.float32)

    seed_arr = jnp.asarray([seed], dtype=jnp.int32)
    kernel = functools.partial(_prenet_kernel, training)

    out = pl.pallas_call(
        kernel,
        out_shape=jax.ShapeDtypeStruct((rows_p, h_pad), jnp.float32),
        grid_spec=pltpu.PrefetchScalarGridSpec(
            num_scalar_prefetch=1,          # seed lives in SMEM
            grid=grid,
            in_specs=[
                pl.BlockSpec((tm, num_mels), lambda i, seed: (i, 0)),     # x tile
                pl.BlockSpec((num_mels, h_pad), lambda i, seed: (0, 0)),  # w1 (resident)
                pl.BlockSpec((1, h_pad), lambda i, seed: (0, 0)),         # b1
                pl.BlockSpec((h_pad, h_pad), lambda i, seed: (0, 0)),     # w2 (resident)
                pl.BlockSpec((1, h_pad), lambda i, seed: (0, 0)),         # b2
            ],
            out_specs=pl.BlockSpec((tm, h_pad), lambda i, seed: (i, 0)),
        ),
        compiler_params=pltpu.CompilerParams(
            dimension_semantics=("parallel",),   # megacore-shardable on v7x
            vmem_limit_bytes=64 << 20,
        ),
    )(seed_arr, x2, w1p, b1p, w2p, b2p)

    out = out[:rows, :hidden]
    return out.reshape(*leading, hidden)


def init_prenet_params(key, num_mels, hidden):
    """Deterministic init matching nn.Linear shapes (stored transposed: (in, out))."""
    k1, k2, k3, k4 = jax.random.split(key, 4)
    bound1 = 1.0 / math.sqrt(num_mels)
    bound2 = 1.0 / math.sqrt(hidden)
    w1 = jax.random.uniform(k1, (num_mels, hidden), jnp.float32, -bound1, bound1)
    b1 = jax.random.uniform(k2, (1, hidden), jnp.float32, -bound1, bound1)
    w2 = jax.random.uniform(k3, (hidden, hidden), jnp.float32, -bound2, bound2)
    b2 = jax.random.uniform(k4, (1, hidden), jnp.float32, -bound2, bound2)
    return w1, b1, w2, b2


if __name__ == "__main__":
    num_mels = 32
    hidden = 64
    batch, seq = 2, 8

    key = jax.random.PRNGKey(0)
    kx, kp = jax.random.split(key)
    x = jax.random.normal(kx, (batch, seq, num_mels), dtype=jnp.float32)
    params = init_prenet_params(kp, num_mels, hidden)

    # Training-mode forward (dropout active, deterministic seed).
    out = jax.block_until_ready(prenet_forward(x, params, seed=0, training=True))
    assert out.shape == (batch, seq, hidden)
    assert bool(jnp.all(out >= 0.0))          # post-ReLU/dropout outputs are non-negative
    assert bool(jnp.all(jnp.isfinite(out)))

    # Eval-mode check against a pure-JAX reference using the same bf16-rounded operands.
    out_eval = jax.block_until_ready(prenet_forward(x, params, training=False))
    w1, b1, w2, b2 = params
    x32 = x.reshape(-1, num_mels).astype(jnp.bfloat16).astype(jnp.float32)
    w1_32 = w1.astype(jnp.bfloat16).astype(jnp.float32)
    w2_32 = w2.astype(jnp.bfloat16).astype(jnp.float32)
    h1 = jnp.maximum(x32 @ w1_32 + b1, 0.0)
    h1 = h1.astype(jnp.bfloat16).astype(jnp.float32)    # kernel casts h to bf16 for 2nd dot
    ref = jnp.maximum(h1 @ w2_32 + b2, 0.0).reshape(batch, seq, hidden)
    assert jnp.allclose(out_eval, ref, atol=2e-2, rtol=2e-2)

    print("KERNEL_OK")
</pallas_src>

<mosaic_0001>
module attributes {stable_mosaic.version = 11 : i64} {
  func.func @_prenet_kernel(%arg0: i32, %arg1: memref<1xi32, #tpu.memory_space<smem>>, %arg2: memref<16x32xbf16, #tpu.memory_space<vmem>>, %arg3: memref<32x128xbf16, #tpu.memory_space<vmem>>, %arg4: memref<1x128xf32, #tpu.memory_space<vmem>>, %arg5: memref<128x128xbf16, #tpu.memory_space<vmem>>, %arg6: memref<1x128xf32, #tpu.memory_space<vmem>>, %arg7: memref<16x128xf32, #tpu.memory_space<vmem>>) attributes {dimension_semantics = [#tpu.dimension_semantics<parallel>], iteration_bounds = array<i64: 1>, scalar_prefetch = 1 : i64, scratch_operands = 0 : i64, tpu.core_type = #tpu.core_type<tc>, window_params = [{transform_indices = @transform_0, window_bounds = array<i64: 16, 32>}, {pipeline_mode = #tpu.pipeline_mode<synchronous>, transform_indices = @transform_1, window_bounds = array<i64: 32, 128>}, {pipeline_mode = #tpu.pipeline_mode<synchronous>, transform_indices = @transform_2, window_bounds = array<i64: 1, 128>}, {pipeline_mode = #tpu.pipeline_mode<synchronous>, transform_indices = @transform_3, window_bounds = array<i64: 128, 128>}, {pipeline_mode = #tpu.pipeline_mode<synchronous>, transform_indices = @transform_4, window_bounds = array<i64: 1, 128>}, {transform_indices = @transform_5, window_bounds = array<i64: 16, 128>}]} {
    %c0 = arith.constant 0 : index
    %c0_0 = arith.constant 0 : index
    %0 = vector.load %arg2[%c0, %c0_0] : memref<16x32xbf16, #tpu.memory_space<vmem>>, vector<16x32xbf16>
    %c0_1 = arith.constant 0 : index
    %c0_2 = arith.constant 0 : index
    %1 = vector.load %arg3[%c0_1, %c0_2] : memref<32x128xbf16, #tpu.memory_space<vmem>>, vector<32x128xbf16>
    %cst = arith.constant dense<0.000000e+00> : vector<16x128xf32>
    %2 = tpu.matmul %0, %1, %cst {dimension_numbers = #tpu.dot_dimension_numbers<[1], [0], [0], [1], [0, 0, 1, 1], [], []>} : vector<16x32xbf16>, vector<32x128xbf16>, vector<16x128xf32> -> vector<16x128xf32>
    %c0_3 = arith.constant 0 : index
    %c0_4 = arith.constant 0 : index
    %3 = vector.load %arg4[%c0_3, %c0_4] : memref<1x128xf32, #tpu.memory_space<vmem>>, vector<1x128xf32>
    %4 = vector.broadcast %3 : vector<1x128xf32> to vector<16x128xf32>
    %5 = arith.addf %2, %4 : vector<16x128xf32>
    %cst_5 = arith.constant 0.000000e+00 : f32
    %6 = vector.broadcast %cst_5 : f32 to vector<16x128xf32>
    %7 = arith.maximumf %5, %6 : vector<16x128xf32>
    %c0_6 = arith.constant 0 : index
    %8 = memref.load %arg1[%c0_6] : memref<1xi32, #tpu.memory_space<smem>>
    %c-1640531535_i32 = arith.constant -1640531535 : i32
    %9 = arith.muli %8, %c-1640531535_i32 : i32
    %c-2048144777_i32 = arith.constant -2048144777 : i32
    %10 = arith.muli %arg0, %c-2048144777_i32 : i32
    %11 = arith.addi %9, %10 : i32
    %c1_i32 = arith.constant 1 : i32
    %c-1028477379_i32 = arith.constant -1028477379 : i32
    %12 = arith.muli %c1_i32, %c-1028477379_i32 : i32
    %13 = arith.addi %11, %12 : i32
    %14 = tpu.iota {dimensions = array<i32: 0>} : vector<16x128xi32>
    %15 = tpu.iota {dimensions = array<i32: 1>} : vector<16x128xi32>
    %c16777619_i32 = arith.constant 16777619 : i32
    %16 = vector.broadcast %c16777619_i32 : i32 to vector<16x128xi32>
    %17 = arith.muli %14, %16 : vector<16x128xi32>
    %18 = arith.addi %17, %15 : vector<16x128xi32>
    %19 = vector.broadcast %13 : i32 to vector<16x128xi32>
    %20 = arith.addi %18, %19 : vector<16x128xi32>
    %c16_i32 = arith.constant 16 : i32
    %21 = vector.broadcast %c16_i32 : i32 to vector<16x128xi32>
    %22 = arith.shrui %20, %21 : vector<16x128xi32>
    %23 = arith.xori %20, %22 : vector<16x128xi32>
    %c2146121005_i32 = arith.constant 2146121005 : i32
    %24 = vector.broadcast %c2146121005_i32 : i32 to vector<16x128xi32>
    %25 = arith.muli %23, %24 : vector<16x128xi32>
    %c15_i32 = arith.constant 15 : i32
    %26 = vector.broadcast %c15_i32 : i32 to vector<16x128xi32>
    %27 = arith.shrui %25, %26 : vector<16x128xi32>
    %28 = arith.xori %25, %27 : vector<16x128xi32>
    %c-2073254261_i32 = arith.constant -2073254261 : i32
    %29 = vector.broadcast %c-2073254261_i32 : i32 to vector<16x128xi32>
    %30 = arith.muli %28, %29 : vector<16x128xi32>
    %c16_i32_7 = arith.constant 16 : i32
    %31 = vector.broadcast %c16_i32_7 : i32 to vector<16x128xi32>
    %32 = arith.shrui %30, %31 : vector<16x128xi32>
    %33 = arith.xori %30, %32 : vector<16x128xi32>
    %c-2147483648_i32 = arith.constant -2147483648 : i32
    %34 = vector.broadcast %c-2147483648_i32 : i32 to vector<16x128xi32>
    %35 = arith.cmpi ult, %33, %34 : vector<16x128xi32>
    %cst_8 = arith.constant 0.000000e+00 : f32
    %36 = vector.broadcast %cst_8 : f32 to vector<16x128xf32>
    %37 = arith.select %35, %7, %36 : vector<16x128xi1>, vector<16x128xf32>
    %38 = arith.truncf %37 : vector<16x128xf32> to vector<16x128xbf16>
    %c0_9 = arith.constant 0 : index
    %c0_10 = arith.constant 0 : index
    %39 = vector.load %arg5[%c0_9, %c0_10] : memref<128x128xbf16, #tpu.memory_space<vmem>>, vector<128x128xbf16>
    %cst_11 = arith.constant dense<0.000000e+00> : vector<16x128xf32>
    %40 = tpu.matmul %38, %39, %cst_11 {dimension_numbers = #tpu.dot_dimension_numbers<[1], [0], [0], [1], [0, 0, 1, 1], [], []>} : vector<16x128xbf16>, vector<128x128xbf16>, vector<16x128xf32> -> vector<16x128xf32>
    %c0_12 = arith.constant 0 : index
    %c0_13 = arith.constant 0 : index
    %41 = vector.load %arg6[%c0_12, %c0_13] : memref<1x128xf32, #tpu.memory_space<vmem>>, vector<1x128xf32>
    %42 = vector.broadcast %41 : vector<1x128xf32> to vector<16x128xf32>
    %43 = arith.addf %40, %42 : vector<16x128xf32>
    %cst_14 = arith.constant 0.000000e+00 : f32
    %44 = vector.broadcast %cst_14 : f32 to vector<16x128xf32>
    %45 = arith.maximumf %43, %44 : vector<16x128xf32>
    %c0_15 = arith.constant 0 : index
    %46 = memref.load %arg1[%c0_15] : memref<1xi32, #tpu.memory_space<smem>>
    %c-1640531535_i32_16 = arith.constant -1640531535 : i32
    %47 = arith.muli %46, %c-1640531535_i32_16 : i32
    %c-2048144777_i32_17 = arith.constant -2048144777 : i32
    %48 = arith.muli %arg0, %c-2048144777_i32_17 : i32
    %49 = arith.addi %47, %48 : i32
    %c2_i32 = arith.constant 2 : i32
    %c-1028477379_i32_18 = arith.constant -1028477379 : i32
    %50 = arith.muli %c2_i32, %c-1028477379_i32_18 : i32
    %51 = arith.addi %49, %50 : i32
    %52 = tpu.iota {dimensions = array<i32: 0>} : vector<16x128xi32>
    %53 = tpu.iota {dimensions = array<i32: 1>} : vector<16x128xi32>
    %c16777619_i32_19 = arith.constant 16777619 : i32
    %54 = vector.broadcast %c16777619_i32_19 : i32 to vector<16x128xi32>
    %55 = arith.muli %52, %54 : vector<16x128xi32>
    %56 = arith.addi %55, %53 : vector<16x128xi32>
    %57 = vector.broadcast %51 : i32 to vector<16x128xi32>
    %58 = arith.addi %56, %57 : vector<16x128xi32>
    %c16_i32_20 = arith.constant 16 : i32
    %59 = vector.broadcast %c16_i32_20 : i32 to vector<16x128xi32>
    %60 = arith.shrui %58, %59 : vector<16x128xi32>
    %61 = arith.xori %58, %60 : vector<16x128xi32>
    %c2146121005_i32_21 = arith.constant 2146121005 : i32
    %62 = vector.broadcast %c2146121005_i32_21 : i32 to vector<16x128xi32>
    %63 = arith.muli %61, %62 : vector<16x128xi32>
    %c15_i32_22 = arith.constant 15 : i32
    %64 = vector.broadcast %c15_i32_22 : i32 to vector<16x128xi32>
    %65 = arith.shrui %63, %64 : vector<16x128xi32>
    %66 = arith.xori %63, %65 : vector<16x128xi32>
    %c-2073254261_i32_23 = arith.constant -2073254261 : i32
    %67 = vector.broadcast %c-2073254261_i32_23 : i32 to vector<16x128xi32>
    %68 = arith.muli %66, %67 : vector<16x128xi32>
    %c16_i32_24 = arith.constant 16 : i32
    %69 = vector.broadcast %c16_i32_24 : i32 to vector<16x128xi32>
    %70 = arith.shrui %68, %69 : vector<16x128xi32>
    %71 = arith.xori %68, %70 : vector<16x128xi32>
    %c-2147483648_i32_25 = arith.constant -2147483648 : i32
    %72 = vector.broadcast %c-2147483648_i32_25 : i32 to vector<16x128xi32>
    %73 = arith.cmpi ult, %71, %72 : vector<16x128xi32>
    %cst_26 = arith.constant 2.000000e+00 : f32
    %74 = vector.broadcast %cst_26 : f32 to vector<16x128xf32>
    %75 = arith.mulf %45, %74 : vector<16x128xf32>
    %cst_27 = arith.constant 0.000000e+00 : f32
    %76 = vector.broadcast %cst_27 : f32 to vector<16x128xf32>
    %77 = arith.select %73, %75, %76 : vector<16x128xi1>, vector<16x128xf32>
    %c0_28 = arith.constant 0 : index
    %c0_29 = arith.constant 0 : index
    %78 = vector.load %arg7[%c0_28, %c0_29] : memref<16x128xf32, #tpu.memory_space<vmem>>, vector<16x128xf32>
    tpu.vector_store %arg7[%c0_28, %c0_29], %77 {strides = array<i32>} : memref<16x128xf32, #tpu.memory_space<vmem>>, vector<16x128xf32>,
    return
  }
  func.func @transform_0(%arg0: i32, %arg1: memref<1xi32, #tpu.memory_space<smem>>) -> (i32, i32) {
    %c0_i32 = arith.constant 0 : i32
    %c0_i32_0 = arith.constant 0 : i32
    return %arg0, %c0_i32 : i32, i32
  }
  func.func @transform_1(%arg0: i32, %arg1: memref<1xi32, #tpu.memory_space<smem>>) -> (i32, i32) {
    %c0_i32 = arith.constant 0 : i32
    %c0_i32_0 = arith.constant 0 : i32
    %c0_i32_1 = arith.constant 0 : i32
    return %c0_i32, %c0_i32_0 : i32, i32
  }
  func.func @transform_2(%arg0: i32, %arg1: memref<1xi32, #tpu.memory_space<smem>>) -> (i32, i32) {
    %c0_i32 = arith.constant 0 : i32
    %c0_i32_0 = arith.constant 0 : i32
    %c0_i32_1 = arith.constant 0 : i32
    return %c0_i32, %c0_i32_0 : i32, i32
  }
  func.func @transform_3(%arg0: i32, %arg1: memref<1xi32, #tpu.memory_space<smem>>) -> (i32, i32) {
    %c0_i32 = arith.constant 0 : i32
    %c0_i32_0 = arith.constant 0 : i32
    %c0_i32_1 = arith.constant 0 : i32
    return %c0_i32, %c0_i32_0 : i32, i32
  }
  func.func @transform_4(%arg0: i32, %arg1: memref<1xi32, #tpu.memory_space<smem>>) -> (i32, i32) {
    %c0_i32 = arith.constant 0 : i32
    %c0_i32_0 = arith.constant 0 : i32
    %c0_i32_1 = arith.constant 0 : i32
    return %c0_i32, %c0_i32_0 : i32, i32
  }
  func.func @transform_5(%arg0: i32, %arg1: memref<1xi32, #tpu.memory_space<smem>>) -> (i32, i32) {
    %c0_i32 = arith.constant 0 : i32
    %c0_i32_0 = arith.constant 0 : i32
    return %arg0, %c0_i32 : i32, i32
  }
}

</mosaic_0001>

<bundles_post_ra>
// kernel: tpu_custom_call.1
= control target key start
LH: loop header
LB: loop body
LE: loop exit
PB: predicated region body
PF: predicated region fallthrough
CT: control target
= control target key end

     0   :  { %12 = vsyncpa [#allocation5], 0  ;;  %s730_s0 = inlined_call_operand.<no memory space> [shape: s32[1], index: 0, kind: input, shape index: {}]   ;;  %s731_s1 = inlined_call_operand.hbm [shape: bf16[16,32], index: 1, kind: input, shape index: {}]   ;;  %s732_s2 = inlined_call_operand.hbm [shape: bf16[32,128], index: 2, kind: input, shape index: {}]   ;;  %s733_s3 = inlined_call_operand.hbm [shape: f32[1,128], index: 3, kind: input, shape index: {}]   ;;  %s734_s4 = inlined_call_operand.hbm [shape: bf16[128,128], index: 4, kind: input, shape index: {}]   ;;  %s735_s5 = inlined_call_operand.hbm [shape: f32[1,128], index: 5, kind: input, shape index: {}]   ;;  %s736_s6 = inlined_call_operand.hbm [shape: f32[16,128], index: 6, kind: output, shape index: {}]  }
   0x1   :  { %13 = vsyncpa [#allocation8], 0 }
   0x2   :  { %14 = vsyncpa [#allocation11], 0 }
   0x3   :  { %15 = vsyncpa [#allocation6], 0  ;;  %s584_s21 = smov [#allocation7]   ;;  %s585_s23 = smov [#allocation10]  }
   0x4   :  { %s33_s22 = sshll.u32 %s584_s21, 4  ;;  %s55_s24 = sshll.u32 %s585_s23, 4  ;;  %s34_s22 = int_to_ptr.vmem [resolvable:$true] %s33_s22  ;;  %s631_s24 = int_to_ptr.vmem [resolvable:$true] %s55_s24 }
   0x5   :  { %s444_s27 = scalar_lea.hbm %s732_s2, 256 }
   0x6   :  { %p445_p0 = scmp.ne.s32.totalorder %s732_s2, %s444_s27  ;;  %p448_p1 = scmp.lt.u32.totalorder %s444_s27, %s732_s2 }
   0x8   :  { %p450_p2 = pnand %p448_p1, %p445_p0 }
   0xa   :  { %453 = shalt.err (!%p450_p2)
}
   0xb   :  { %s454_s8 = scalar_lea.vmem %s34_s22, 256  ;;  %p459_p4 = scmp.lt.s32.totalorder %s34_s22, %s34_s22 }
   0xc   :  { %p455_p3 = scmp.ne.s32.totalorder %s34_s22, %s454_s8  ;;  %p460_p5 = scmp.lt.s32.totalorder %s454_s8, %s454_s8 }
   0xe   :  { %p461_p6 = por %p460_p5, %p459_p4 }
  0x10   :  { %p462_p7 = pnand %p461_p6, %p455_p3 }
  0x12   :  { %465 = shalt.err (!%p462_p7)
}
  0x13   :  { %s586_s9 = smov 64   ;;  %s587_s10 = smov 4  }
  0x14   :  { %39 = dma.hbm_to_vmem [thread:$0]  %s732_s2, 256, %s34_s22, [#allocation8], %s586_s9, %s586_s9, %s587_s10  }
  0x15   :  { %s466_s15 = scalar_lea.hbm %s734_s4, 1024 }
  0x16   :  { %p467_p8 = scmp.ne.s32.totalorder %s734_s4, %s466_s15  ;;  %p470_p9 = scmp.lt.u32.totalorder %s466_s15, %s734_s4 }
  0x18   :  { %p472_p10 = pnand %p470_p9, %p467_p8 }
  0x1a   :  { %475 = shalt.err (!%p472_p10)
}
  0x1b   :  { %s476_s20 = scalar_lea.vmem %s631_s24, 1024  ;;  %p481_p12 = scmp.lt.s32.totalorder %s631_s24, %s631_s24 }
  0x1c   :  { %p477_p11 = scmp.ne.s32.totalorder %s631_s24, %s476_s20  ;;  %p482_p13 = scmp.lt.s32.totalorder %s476_s20, %s476_s20 }
  0x1e   :  { %p483_p0 = por %p482_p13, %p481_p12 }
  0x20   :  { %p484_p1 = pnand %p483_p0, %p477_p11 }
  0x22   :  { %487 = shalt.err (!%p484_p1)
}
  0x23   :  { %61 = dma.hbm_to_vmem [thread:$0]  %s734_s4, 1024, %s631_s24, [#allocation11], %s586_s9, %s586_s9, %s587_s10  }
  0x24   :  { %s588_s22 = smov [#allocation4]   ;;  %s589_s25 = smov [#allocation9]  }
  0x25   :  { %s21_s23 = sshll.u32 %s588_s22, 4  ;;  %s46_s26 = sshll.u32 %s589_s25, 4  ;;  %s22_s23 = int_to_ptr.vmem [resolvable:$true] %s21_s23  ;;  %s47_s26 = int_to_ptr.vmem [resolvable:$true] %s46_s26 }
  0x26   :  { %s488_s29 = scalar_lea.hbm %s731_s1, 128 }
  0x27   :  { %p489_p2 = scmp.ne.s32.totalorder %s731_s1, %s488_s29  ;;  %p492_p3 = scmp.lt.u32.totalorder %s488_s29, %s731_s1 }
  0x29   :  { %p494_p4 = pnand %p492_p3, %p489_p2 }
  0x2b   :  { %497 = shalt.err (!%p494_p4)
}
  0x2c   :  { %s498_s4 = scalar_lea.vmem %s22_s23, 128  ;;  %p503_p6 = scmp.lt.s32.totalorder %s22_s23, %s22_s23 }
  0x2d   :  { %p499_p5 = scmp.ne.s32.totalorder %s22_s23, %s498_s4  ;;  %p504_p7 = scmp.lt.s32.totalorder %s498_s4, %s498_s4 }
  0x2f   :  { %p505_p8 = por %p504_p7, %p503_p6 }
  0x31   :  { %p506_p9 = pnand %p505_p8, %p499_p5 }
  0x33   :  { %509 = shalt.err (!%p506_p9)
}
  0x34   :  { %27 = dma.hbm_to_vmem [thread:$0]  %s731_s1, 128, %s22_s23, [#allocation5], %s586_s9, %s586_s9, %s587_s10  }
  0x35   :  { %s510_s15 = scalar_lea.hbm %s733_s3, 16 }
  0x36   :  { %p511_p10 = scmp.ne.s32.totalorder %s733_s3, %s510_s15  ;;  %p514_p11 = scmp.lt.u32.totalorder %s510_s15, %s733_s3 }
  0x38   :  { %p516_p12 = pnand %p514_p11, %p511_p10 }
  0x3a   :  { %519 = shalt.err (!%p516_p12)
}
  0x3b   :  { %s520_s20 = scalar_lea.vmem %s47_s26, 16  ;;  %s524_s2 = scalar_lea.vmem %s47_s26, 32 }
  0x3c   :  { %p521_p13 = scmp.ne.s32.totalorder %s47_s26, %s520_s20  ;;  %p525_p0 = scmp.lt.s32.totalorder %s47_s26, %s47_s26 }
  0x3d   :  { %p526_p1 = scmp.lt.s32.totalorder %s524_s2, %s520_s20 }
  0x3f   :  { %p527_p2 = por %p526_p1, %p525_p0 }
  0x41   :  { %p528_p3 = pnand %p527_p2, %p521_p13 }
  0x43   :  { %531 = shalt.err (!%p528_p3)
}
  0x44   :  { %49 = dma.hbm_to_vmem [thread:$0]  %s733_s3, 16, %s47_s26, [#allocation8]  }
  0x45   :  { %s590_s10 = smov [#allocation12]   ;;  %s532_s25 = scalar_lea.hbm %s735_s5, 16 }
  0x46   :  { %s68_s21 = sshll.u32 %s590_s10, 4  ;;  %p533_p4 = scmp.ne.s32.totalorder %s735_s5, %s532_s25  ;;  %s69_s21 = int_to_ptr.vmem [resolvable:$true] %s68_s21 }
  0x47   :  { %p536_p5 = scmp.lt.u32.totalorder %s532_s25, %s735_s5 }
  0x49   :  { %p538_p6 = pnand %p536_p5, %p533_p4 }
  0x4b   :  { %541 = shalt.err (!%p538_p6)
}
  0x4c   :  { %s542_s7 = scalar_lea.vmem %s69_s21, 16  ;;  %s546_s3 = scalar_lea.vmem %s69_s21, 32 }
  0x4d   :  { %p543_p7 = scmp.ne.s32.totalorder %s69_s21, %s542_s7  ;;  %p547_p8 = scmp.lt.s32.totalorder %s69_s21, %s69_s21 }
  0x4e   :  { %p548_p9 = scmp.lt.s32.totalorder %s546_s3, %s542_s7 }
  0x50   :  { %p549_p10 = por %p548_p9, %p547_p8 }
  0x52   :  { %p550_p11 = pnand %p549_p10, %p543_p7 }
  0x54   :  { %553 = shalt.err (!%p550_p11)
}
  0x55   :  { %71 = dma.hbm_to_vmem [thread:$0]  %s735_s5, 16, %s69_s21, [#allocation11]  }
  0x56   :  { %576 = dma.done.wait [#allocation5], 128  }
  0x57   :  { %577 = vsyncadd [#allocation5], 4294967168 }
  0x58   :  { %578 = dma.done.wait [#allocation8], 272  }
  0x59   :  { %579 = vsyncadd [#allocation8], 4294967024 }
  0x5a   :  { %580 = dma.done.wait [#allocation11], 1040  }
  0x5b   :  { %581 = vsyncadd [#allocation11], 4294966256  ;;  %v591_v0 = vmov 0.0   ;;  %vm592_vm0 = vmmov 0   ;;  %v433_v1 = vld [vmem:[#allocation7] sm:$0xff]   ;;  %v434_v2 = vld [vmem:[#allocation7 + $0x8] sm:$0xff]   ;;  %v170_v12 = vlaneseq }
  0x5c   :  { %393 = vmatprep.subr.bf16.mxu0 %v591_v0  ;;  %397 = vmatprep.mubr.msk.bf16.mxu0 %vm592_vm0, %v591_v0  ;;  %v436_v3 = vld [vmem:[#allocation10] sm:$0xff]   ;;  %v437_v5 = vld [vmem:[#allocation10 + $0x8] sm:$0xff]   ;;  %vm118_vm1 = vcmask 261120   ;;  %v438_v6 = vld [vmem:[#allocation10 + $0x10] sm:$0xff]   ;;  %s166_s4 = smul.u32 2654435761, %s730_s0 }
  0x5d   :  { %401 = vmatprep.subr.bf16.mxu1 %v591_v0  ;;  %417 = vmatprep.mubr.msk.bf16.mxu1 %vm592_vm0, %v591_v0  ;;  %v435_v4 = vld [vmem:[#allocation4] sm:$0xff]   ;;  %v439_v7 = vld [vmem:[#allocation10 + $0x18] sm:$0xff]   ;;  %v442_v10 = vld [vmem:[#allocation10 + $0x30] sm:$0xff]   ;;  %v171_v13 = vshrl.u32 %v170_v12, 7  ;;  %v174_v15 = vand.u32 127, %v170_v12  ;;  %s593_s0 = smov [#allocation13]  }
  0x5e   :  { %394 = vmatpush3.bf16.msra.mxu0 %v433_v1  ;;  %402 = vmatpush3.bf16.msra.mxu1 %v436_v3  ;;  %v440_v8 = vld [vmem:[#allocation10 + $0x20] sm:$0xff]   ;;  %v441_v9 = vld [vmem:[#allocation10 + $0x28] sm:$0xff]   ;;  %v443_v11 = vld [vmem:[#allocation10 + $0x38] sm:$0xff]   ;;  %s169_s13 = sadd.s32 3266489917, %s166_s4  ;;  %s350_s17 = sshll.u32 %s593_s0, 4  ;;  %s351_s17 = int_to_ptr.vmem [resolvable:$true] %s350_s17 }
  0x5f   :  { %395 = vmatprep.subr.bf16.mxu0 %v591_v0  ;;  %403 = vmatprep.subr.bf16.mxu1 %v591_v0  ;;  %v172_v14 = vadd.s32 8, %v171_v13  ;;  %v175_v16 = vmul.u32 16777619, %v171_v13  ;;  %v179_v20 = vstv %s169_s13  ;;  %v364_v37 = vld [vmem:[#allocation9] ss:$0 sm:$0xff]  ;;  %s554_s18 = scalar_lea.vmem %s351_s17, 256  ;;  %p559_p13 = scmp.lt.s32.totalorder %s351_s17, %s351_s17 }
  0x60   :  { %s317_s16 = sadd.s32 2238012538, %s166_s4  ;;  %v369_v1 = vld [vmem:[#allocation12] ss:$0 sm:$0xff]  ;;  %p555_p12 = scmp.ne.s32.totalorder %s351_s17, %s554_s18 }
  0x61   :  { %v176_v17 = vmul.u32 16777619, %v172_v14  ;;  %v177_v18 = vadd.s32 %v175_v16, %v174_v15  ;;  %v318_v49 = vstv %s317_s16  ;;  %p560_p0 = scmp.lt.s32.totalorder %s554_s18, %s554_s18 }
  0x62   :  { %396 = vmatpush3.bf16.msra.mxu0 %v434_v2  ;;  %404 = vmatpush3.bf16.msra.mxu1 %v437_v5 }
  0x63   :  { %405 = vmatprep.subr.bf16.mxu1 %v591_v0  ;;  %v178_v19 = vadd.s32 %v176_v17, %v174_v15  ;;  %v180_v21 = vadd.s32 %v179_v20, %v177_v18  ;;  %v319_v50 = vadd.s32 %v318_v49, %v177_v18  ;;  %p561_p1 = por %p560_p0, %p559_p13 }
  0x65   :  { %398 = vmatmul.mubr.msk.bf16.vlgmr.msra.gmra.mrb[0].mxu0 %vm118_vm1, %v435_v4  ;;  %v181_v22 = vadd.s32 %v179_v20, %v178_v19  ;;  %v182_v23 = vshrl.u32 %v180_v21, 16  ;;  %v320_v51 = vadd.s32 %v318_v49, %v178_v19  ;;  %v321_v52 = vshrl.u32 %v319_v50, 16  ;;  %p562_p2 = pnand %p561_p1, %p555_p12 }
  0x66   :  { %406 = vmatpush3.bf16.msra.mxu1 %v438_v6 }
  0x67   :  { %407 = vmatprep.subr.bf16.mxu1 %v591_v0  ;;  %v183_v24 = vshrl.u32 %v181_v22, 16  ;;  %v184_v25 = vxor.u32 %v182_v23, %v180_v21  ;;  %v322_v53 = vshrl.u32 %v320_v51, 16  ;;  %v323_v54 = vxor.u32 %v321_v52, %v319_v50 }
  0x69   :  { %v185_v26 = vxor.u32 %v183_v24, %v181_v22  ;;  %v186_v27 = vmul.u32 2146121005, %v184_v25  ;;  %v324_v55 = vxor.u32 %v322_v53, %v320_v51  ;;  %v325_v56 = vmul.u32 2146121005, %v323_v54 }
  0x6a   :  { %408 = vmatpush3.bf16.msra.mxu1 %v439_v7 }
  0x6b   :  { %409 = vmatprep.subr.bf16.mxu1 %v591_v0  ;;  %v187_v28 = vmul.u32 2146121005, %v185_v26  ;;  %v188_v29 = vshrl.u32 %v186_v27, 15  ;;  %v326_v57 = vmul.u32 2146121005, %v324_v55  ;;  %v327_v58 = vshrl.u32 %v325_v56, 15 }
  0x6d   :  { %v189_v30 = vshrl.u32 %v187_v28, 15  ;;  %v190_v31 = vxor.u32 %v188_v29, %v186_v27  ;;  %v328_v59 = vshrl.u32 %v326_v57, 15  ;;  %v329_v60 = vxor.u32 %v327_v58, %v325_v56 }
  0x6e   :  { %410 = vmatpush3.bf16.msra.mxu1 %v440_v8 }
  0x6f   :  { %411 = vmatprep.subr.bf16.mxu1 %v591_v0  ;;  %v191_v32 = vxor.u32 %v189_v30, %v187_v28  ;;  %v192_v33 = vmul.u32 2221713035, %v190_v31  ;;  %v330_v61 = vxor.u32 %v328_v59, %v326_v57  ;;  %v331_v62 = vmul.u32 2221713035, %v329_v60 }
  0x71   :  { %v193_v34 = vmul.u32 2221713035, %v191_v32  ;;  %v194_v35 = vshrl.u32 %v192_v33, 16  ;;  %v332_v63 = vmul.u32 2221713035, %v330_v61 }
  0x72   :  { %412 = vmatpush3.bf16.msra.mxu1 %v441_v9 }
  0x73   :  { %413 = vmatprep.subr.bf16.mxu1 %v591_v0  ;;  %v195_v36 = vshrl.u32 %v193_v34, 16  ;;  %v196_v38 = vxor.u32 %v194_v35, %v192_v33  ;;  %v334_v2 = vshrl.u32 %v332_v63, 16 }
  0x75   :  { %v197_v39 = vxor.u32 %v195_v36, %v193_v34  ;;  %vm198_vm2 = vcmp.lt.u32.totalorder %v196_v38, 2147483648  ;;  %v336_v8 = vxor.u32 %v334_v2, %v332_v63 }
  0x76   :  { %414 = vmatpush3.bf16.msra.mxu1 %v442_v10 }
  0x77   :  { %415 = vmatprep.subr.bf16.mxu1 %v591_v0  ;;  %vm199_vm3 = vcmp.lt.u32.totalorder %v197_v39, 2147483648  ;;  %v333_v0 = vshrl.u32 %v331_v62, 16  ;;  %vm338_vm6 = vcmp.lt.u32.totalorder %v336_v8, 2147483648 }
  0x78   :  { %vm378_vm4 = vmpackc.low %vm199_vm3, %vm198_vm2 }
  0x79   :  { %v335_v4 = vxor.u32 %v333_v0, %v331_v62 }
  0x7a   :  { %416 = vmatpush3.bf16.msra.mxu1 %v443_v11 }
  0x7b   :  { %vm337_vm5 = vcmp.lt.u32.totalorder %v335_v4, 2147483648 }
 0x138   :  { %v156_v40 = vpop.f32.mrb[0].mxu0 }
 0x139   :  { %v157_v41 = vadd.f32 %v364_v37, %v156_v40  ;;  %v399_v42 = vpop.f32.mrb[1].mxu0 }
 0x13a   :  { %v159_v43 = vpop.f32.mrb[2].mxu0 }
 0x13b   :  { %v160_v44 = vadd.f32 %v364_v37, %v159_v43  ;;  %v400_v45 = vpop.f32.mrb[3].mxu0  ;;  %v163_v46 = vmax.f32 %v157_v41, 0.0 }
 0x13d   :  { %v164_v47 = vmax.f32 %v160_v44, 0.0 }
 0x13f   :  { %v379_v48 = vpack.c.bf16 %v164_v47, %v163_v46 }
 0x141   :  { %418 = vmatmul.mubr.msk.bf16.vlgmr.msra.gmra.mrb[0].mxu1 %vm378_vm4, %v379_v48 }
 0x214   :  { %v308_v3 = vpop.f32.mrb[0].mxu1 }
 0x215   :  { %v309_v5 = vadd.f32 %v369_v1, %v308_v3  ;;  %v419_v6 = vpop.f32.mrb[1].mxu1 }
 0x216   :  { %v311_v7 = vpop.f32.mrb[2].mxu1 }
 0x217   :  { %v315_v9 = vmax.f32 %v309_v5, 0.0  ;;  %v312_v10 = vadd.f32 %v369_v1, %v311_v7  ;;  %v420_v11 = vpop.f32.mrb[3].mxu1 }
 0x219   :  { %v339_v12 = vmul.f32 2.0, %v315_v9  ;;  %v316_v13 = vmax.f32 %v312_v10, 0.0 }
 0x21b   :  { %v341_v14 = vsel %vm337_vm5, %v339_v12, 0.0  ;;  %v340_v15 = vmul.f32 2.0, %v316_v13 }
 0x21c   :  { %343 = vst [vmem:[#allocation13] sm:$0xff] %v341_v14 }
 0x21d   :  { %v342_v16 = vsel %vm338_vm6, %v340_v15, 0.0 }
 0x21e   :  { %344 = vst [vmem:[#allocation13 + $0x8] sm:$0xff] %v342_v16 }
 0x21f   :  { %565 = shalt.err (!%p562_p2)
}
 0x220   :  { %s566_s2 = scalar_lea.hbm %s736_s6, 256 }
 0x221   :  { %p567_p3 = scmp.ne.s32.totalorder %s736_s6, %s566_s2  ;;  %p570_p4 = scmp.lt.u32.totalorder %s566_s2, %s736_s6 }
 0x223   :  { %p572_p5 = pnand %p570_p4, %p567_p3 }
 0x225   :  { %575 = shalt.err (!%p572_p5)
}
 0x226   :  { %s594_s22 = smov 128   ;;  %s595_s23 = smov 8  }
 0x227   :  { %356 = dma.vmem_to_hbm [thread:$0]  %s351_s17, 256, %s736_s6, [#allocation6], %s594_s22, %s594_s22, %s595_s23  }
 0x228   :  { %582 = dma.done.wait [#allocation6], 256  }
 0x229   :  { %583 = vsyncadd [#allocation6], 4294967040 }
 0x22a   :  { %360 = vsyncpa [#allocation5], 1 }
 0x22b   :  { %361 = vsyncpa [#allocation8], 1 }
 0x22c   :  { %362 = vsyncpa [#allocation11], 1 }
 0x22d   :  { %363 = vsyncpa [#allocation6], 1 }

</bundles_post_ra>
